<compile_context>
chip_gen: v7x
topology: tpu7x:2x2x1
jax: 0.10.0
libtpu: 0.0.40
codegen_flags: <defaults>
</compile_context>

<pallas_src>
import functools

import jax
import jax.numpy as jnp
from jax.experimental import pallas as pl
from jax.experimental.pallas import tpu as pltpu

LANE = 128
SUB = 8


def _round_up(x, m):
    return (x + m - 1) // m * m


def _epilogue_dtype():
    """bf16 bias+GELU epilogue on v6e/v7x (bf16 VPU/EUP); f32 elsewhere (v5e)."""
    try:
        kind = jax.devices()[0].device_kind.lower()
    except Exception:
        return jnp.float32
    if "v6" in kind or "v7" in kind:
        return jnp.bfloat16
    return jnp.float32


def _make_encoder_kernel(TB, TN, N, ep_dtype):
    """Fused patch-embed + GELU + per-batch mean-pool + projection.

    Grid = (batch tiles [parallel], patch-reduction tiles [arbitrary, last]).
    acc_ref holds the per-batch running sum of gelu(x @ w1 + b1) in f32; the
    (1/N) scale, the batched projection, and the store happen once per batch
    tile in a pl.when(last) epilogue (accumulator pattern).
    """
    inv_n = 1.0 / N

    def kernel(x_ref, w1_ref, b1_ref, w2_ref, b2_ref, out_ref, acc_ref):
        ni = pl.program_id(1)

        @pl.when(ni == 0)
        def _():
            acc_ref[...] = jnp.zeros_like(acc_ref)

        # Patch embedding for this (TB, TN) tile: one MXU matmul, bf16 in,
        # f32 accumulate.  K (=C*P*P) deliberately unpadded.
        K = x_ref.shape[-1]
        x2 = x_ref[...].reshape(TB * TN, K)          # free: TN % 8 == 0
        h = jnp.dot(x2, w1_ref[...], preferred_element_type=jnp.float32)

        # Bias + GELU epilogue: bf16 on v6e/v7x (halves VALU/EUP work and vreg
        # pressure), f32 on v5e (no bf16 VPU/EUP path).
        h = h.astype(ep_dtype) + b1_ref[...].astype(ep_dtype)
        h = jax.nn.gelu(h, approximate=True)

        # Per-batch partial sum over this patch tile, accumulated in f32.
        acc_ref[...] += h.astype(jnp.float32).reshape(TB, TN, -1).sum(axis=1)

        @pl.when(ni == pl.num_programs(1) - 1)
        def _():
            pooled = acc_ref[...] * inv_n            # mean over N patches
            feat = jnp.dot(pooled.astype(w2_ref.dtype), w2_ref[...],
                           preferred_element_type=jnp.float32)
            out_ref[...] = (feat + b2_ref[...]).astype(out_ref.dtype)

    return kernel


def prepare_weights(w1, b1, w2, b2):
    """Pad/cast the encoder weights ONCE (hoisted out of the per-call path).

    Lane-pads the output dims D and F to multiples of 128 so both matmuls and
    the final store are lane-dense, and casts the MXU operands to bf16.  The
    contraction dim K is NOT padded (saves the 2.7x HBM inflation of x).
    """
    K, D = w1.shape
    F = w2.shape[1]
    Dp = _round_up(D, LANE)
    Fp = _round_up(F, LANE)
    w1_p = jnp.zeros((K, Dp), jnp.bfloat16).at[:, :D].set(w1.astype(jnp.bfloat16))
    b1_p = jnp.zeros((1, Dp), jnp.float32).at[:, :D].set(
        b1.astype(jnp.float32)[None, :])
    w2_p = jnp.zeros((Dp, Fp), jnp.bfloat16).at[:D, :F].set(w2.astype(jnp.bfloat16))
    b2_p = jnp.zeros((1, Fp), jnp.float32).at[:, :F].set(
        b2.astype(jnp.float32)[None, :])
    return w1_p, b1_p, w2_p, b2_p, F


@functools.partial(jax.jit, static_argnames=("patch_size", "feat_dim", "tile_n"))
def model_wrapper_forward(images, w1_p, b1_p, w2_p, b2_p, *,
                          patch_size, feat_dim, tile_n=8):
    """ModelWrapper.forward(images) -> features. Images are NCHW f32."""
    B, C, H, W = images.shape
    P = patch_size
    assert H % P == 0 and W % P == 0
    nh, nw = H // P, W // P
    N = nh * nw
    K = C * P * P
    Kw, Dp = w1_p.shape
    Fp = w2_p.shape[1]
    assert Kw == K

    # NCHW -> (B, N, K) patch unfold + bf16 cast: one fused XLA copy, no
    # zero-padded duplicate of the activation in HBM.
    # TODO(synk): for a real CLIP ViT, fold this unfold into the kernel's
    # index_map over (b, nh) patch-row blocks so images are read only once.
    patches = images.reshape(B, C, nh, P, nw, P)
    patches = jnp.transpose(patches, (0, 2, 4, 1, 3, 5)).reshape(B, N, K)
    x = patches.astype(jnp.bfloat16)

    # Tiling: whole (toy) batch per batch tile; tile_n patch rows per reduction
    # step.  At real-ViT scale pick TB a multiple of 8 (>=128 rows ideally) and
    # bound 2*(TB*TN*K*2B) + resident weights + acc under ~48 MiB for v7x.
    TB = B
    TN = tile_n
    assert N % TN == 0 and TN % SUB == 0, "patch tile must be a multiple of 8"
    # TODO(synk): N not a multiple of 8 (e.g. ViT CLS token, N=197) needs a
    # padded/masked final patch tile; not required for these shapes.

    ep_dtype = _epilogue_dtype()

    cost = pl.CostEstimate(
        flops=2 * B * N * K * Dp + 2 * B * Dp * Fp,
        transcendentals=B * N * Dp,                  # tanh-GELU
        bytes_accessed=(B * N * K * 2 + K * Dp * 2 + Dp * Fp * 2
                        + (Dp + Fp) * 4 + B * Fp * 4),
    )

    grid_spec = pltpu.PrefetchScalarGridSpec(
        num_scalar_prefetch=0,
        grid=(B // TB, N // TN),                     # (batch tiles, patch tiles)
        in_specs=[
            pl.BlockSpec((TB, TN, K), lambda bi, ni: (bi, ni, 0)),
            pl.BlockSpec((K, Dp), lambda bi, ni: (0, 0)),
            pl.BlockSpec((1, Dp), lambda bi, ni: (0, 0)),
            pl.BlockSpec((Dp, Fp), lambda bi, ni: (0, 0)),
            pl.BlockSpec((1, Fp), lambda bi, ni: (0, 0)),
        ],
        out_specs=pl.BlockSpec((TB, Fp), lambda bi, ni: (bi, 0)),
        scratch_shapes=[pltpu.VMEM((TB, Dp), jnp.float32)],
    )

    out = pl.pallas_call(
        _make_encoder_kernel(TB, TN, N, ep_dtype),
        out_shape=jax.ShapeDtypeStruct((B, Fp), jnp.float32),
        grid_spec=grid_spec,
        compiler_params=pltpu.CompilerParams(
            # Batch tiles are independent (megacore-shardable on v7x); the
            # patch-reduction axis carries the resident accumulator and is last.
            dimension_semantics=("parallel", "arbitrary"),
            # Explicit limit: v5e's scoped-VMEM default is only 16 MiB.
            vmem_limit_bytes=32 * 1024 * 1024,
        ),
        cost_estimate=cost,
    )(x, w1_p, b1_p, w2_p, b2_p)

    return out[:, :feat_dim]


def _reference_forward(images, w1, b1, w2, b2, *, patch_size):
    B, C, H, W = images.shape
    P = patch_size
    nh, nw = H // P, W // P
    patches = images.reshape(B, C, nh, P, nw, P)
    patches = jnp.transpose(patches, (0, 2, 4, 1, 3, 5)).reshape(B, nh * nw, C * P * P)
    h = jax.nn.gelu(patches @ w1 + b1[None, None, :], approximate=True)
    pooled = jnp.mean(h, axis=1)
    return pooled @ w2 + b2[None, :]


if __name__ == "__main__":
    # Small shapes consistent with an image-encoder forward pass.
    B, C, H, W = 2, 3, 16, 16     # images, NCHW
    P = 4                          # patch size
    K = C * P * P                  # 48
    D = 32                         # hidden width
    F = 64                         # feature dim

    key = jax.random.PRNGKey(0)
    k_img, k_w1, k_b1, k_w2, k_b2 = jax.random.split(key, 5)

    images = jax.random.normal(k_img, (B, C, H, W), dtype=jnp.float32)
    w1 = jax.random.normal(k_w1, (K, D), dtype=jnp.float32) * 0.05
    b1 = jax.random.normal(k_b1, (D,), dtype=jnp.float32) * 0.01
    w2 = jax.random.normal(k_w2, (D, F), dtype=jnp.float32) * 0.05
    b2 = jax.random.normal(k_b2, (F,), dtype=jnp.float32) * 0.01

    # Pad/cast weights once (hoisted out of the forward path per perf review).
    w1_p, b1_p, w2_p, b2_p, feat_dim = prepare_weights(w1, b1, w2, b2)

    feats = model_wrapper_forward(images, w1_p, b1_p, w2_p, b2_p,
                                  patch_size=P, feat_dim=feat_dim, tile_n=8)
    feats = jax.block_until_ready(feats)

    ref = _reference_forward(images, w1, b1, w2, b2, patch_size=P)
    assert feats.shape == (B, F)
    # bf16 MXU inputs (+ possibly bf16 GELU epilogue) with f32 accumulation.
    assert jnp.allclose(feats, ref, atol=2e-2, rtol=2e-2), "mismatch vs reference"

    # TODO(synk): the real wrapped model is a full CLIP ViT; only the
    # patch-embed/pool/project feature path is implemented here synthetically.
    print("KERNEL_OK")
</pallas_src>

<mosaic_0001>
module attributes {stable_mosaic.version = 11 : i64} {
  func.func @kernel(%arg0: i32, %arg1: i32, %arg2: memref<2x8x48xbf16, #tpu.memory_space<vmem>>, %arg3: memref<48x128xbf16, #tpu.memory_space<vmem>>, %arg4: memref<1x128xf32, #tpu.memory_space<vmem>>, %arg5: memref<128x128xbf16, #tpu.memory_space<vmem>>, %arg6: memref<1x128xf32, #tpu.memory_space<vmem>>, %arg7: memref<2x128xf32, #tpu.memory_space<vmem>>, %arg8: memref<2x128xf32, #tpu.memory_space<vmem>>) attributes {dimension_semantics = [#tpu.dimension_semantics<parallel>, #tpu.dimension_semantics<arbitrary>], iteration_bounds = array<i64: 1, 2>, scalar_prefetch = 0 : i64, scratch_operands = 1 : i64, tpu.core_type = #tpu.core_type<tc>, window_params = [{transform_indices = @transform_0, window_bounds = array<i64: 2, 8, 48>}, {pipeline_mode = #tpu.pipeline_mode<synchronous>, transform_indices = @transform_1, window_bounds = array<i64: 48, 128>}, {pipeline_mode = #tpu.pipeline_mode<synchronous>, transform_indices = @transform_2, window_bounds = array<i64: 1, 128>}, {pipeline_mode = #tpu.pipeline_mode<synchronous>, transform_indices = @transform_3, window_bounds = array<i64: 128, 128>}, {pipeline_mode = #tpu.pipeline_mode<synchronous>, transform_indices = @transform_4, window_bounds = array<i64: 1, 128>}, {transform_indices = @transform_5, window_bounds = array<i64: 2, 128>}]} {
    %c0_i32 = arith.constant 0 : i32
    %0 = arith.cmpi eq, %arg1, %c0_i32 : i32
    %1 = arith.extui %0 : i1 to i32
    %c0_i32_0 = arith.constant 0 : i32
    %2 = arith.cmpi ne, %1, %c0_i32_0 : i32
    scf.if %2 {
      %cst_17 = arith.constant 0.000000e+00 : f32
      %31 = vector.broadcast %cst_17 : f32 to vector<2x128xf32>
      %c0_18 = arith.constant 0 : index
      %c0_19 = arith.constant 0 : index
      %32 = vector.load %arg8[%c0_18, %c0_19] : memref<2x128xf32, #tpu.memory_space<vmem>>, vector<2x128xf32>
      tpu.vector_store %arg8[%c0_18, %c0_19], %31 {strides = array<i32>} : memref<2x128xf32, #tpu.memory_space<vmem>>, vector<2x128xf32>,
    } else {
    }
    %c0 = arith.constant 0 : index
    %c0_1 = arith.constant 0 : index
    %c0_2 = arith.constant 0 : index
    %3 = vector.load %arg2[%c0, %c0_1, %c0_2] : memref<2x8x48xbf16, #tpu.memory_space<vmem>>, vector<2x8x48xbf16>
    %4 = vector.shape_cast %3 : vector<2x8x48xbf16> to vector<16x48xbf16>
    %c0_3 = arith.constant 0 : index
    %c0_4 = arith.constant 0 : index
    %5 = vector.load %arg3[%c0_3, %c0_4] : memref<48x128xbf16, #tpu.memory_space<vmem>>, vector<48x128xbf16>
    %cst = arith.constant dense<0.000000e+00> : vector<16x128xf32>
    %6 = tpu.matmul %4, %5, %cst {dimension_numbers = #tpu.dot_dimension_numbers<[1], [0], [0], [1], [0, 0, 1, 1], [], []>} : vector<16x48xbf16>, vector<48x128xbf16>, vector<16x128xf32> -> vector<16x128xf32>
    %c0_5 = arith.constant 0 : index
    %c0_6 = arith.constant 0 : index
    %7 = vector.load %arg4[%c0_5, %c0_6] : memref<1x128xf32, #tpu.memory_space<vmem>>, vector<1x128xf32>
    %8 = vector.broadcast %7 : vector<1x128xf32> to vector<16x128xf32>
    %9 = arith.addf %6, %8 : vector<16x128xf32>
    %10 = arith.mulf %9, %9 : vector<16x128xf32>
    %11 = arith.mulf %9, %10 : vector<16x128xf32>
    %cst_7 = arith.constant 4.471500e-02 : f32
    %12 = vector.broadcast %cst_7 : f32 to vector<16x128xf32>
    %13 = arith.mulf %12, %11 : vector<16x128xf32>
    %14 = arith.addf %9, %13 : vector<16x128xf32>
    %cst_8 = arith.constant 0.797884583 : f32
    %15 = vector.broadcast %cst_8 : f32 to vector<16x128xf32>
    %16 = arith.mulf %15, %14 : vector<16x128xf32>
    %17 = math.tanh %16 : vector<16x128xf32>
    %cst_9 = arith.constant 1.000000e+00 : f32
    %18 = vector.broadcast %cst_9 : f32 to vector<16x128xf32>
    %19 = arith.addf %18, %17 : vector<16x128xf32>
    %cst_10 = arith.constant 5.000000e-01 : f32
    %20 = vector.broadcast %cst_10 : f32 to vector<16x128xf32>
    %21 = arith.mulf %20, %19 : vector<16x128xf32>
    %22 = arith.mulf %9, %21 : vector<16x128xf32>
    %c0_11 = arith.constant 0 : index
    %c0_12 = arith.constant 0 : index
    %23 = vector.load %arg8[%c0_11, %c0_12] : memref<2x128xf32, #tpu.memory_space<vmem>>, vector<2x128xf32>
    %24 = vector.shape_cast %22 : vector<16x128xf32> to vector<2x8x128xf32>
    %cst_13 = arith.constant dense<0.000000e+00> : vector<2x128xf32>
    %25 = vector.multi_reduction <add>, %24, %cst_13 [1] : vector<2x8x128xf32> to vector<2x128xf32>
    %26 = arith.addf %23, %25 : vector<2x128xf32>
    %c0_14 = arith.constant 0 : index
    %c0_15 = arith.constant 0 : index
    %27 = vector.load %arg8[%c0_14, %c0_15] : memref<2x128xf32, #tpu.memory_space<vmem>>, vector<2x128xf32>
    tpu.vector_store %arg8[%c0_14, %c0_15], %26 {strides = array<i32>} : memref<2x128xf32, #tpu.memory_space<vmem>>, vector<2x128xf32>,
    %c1_i32 = arith.constant 1 : i32
    %28 = arith.cmpi eq, %arg1, %c1_i32 : i32
    %29 = arith.extui %28 : i1 to i32
    %c0_i32_16 = arith.constant 0 : i32
    %30 = arith.cmpi ne, %29, %c0_i32_16 : i32
    scf.if %30 {
      %c0_17 = arith.constant 0 : index
      %c0_18 = arith.constant 0 : index
      %31 = vector.load %arg8[%c0_17, %c0_18] : memref<2x128xf32, #tpu.memory_space<vmem>>, vector<2x128xf32>
      %cst_19 = arith.constant 6.250000e-02 : f32
      %32 = vector.broadcast %cst_19 : f32 to vector<2x128xf32>
      %33 = arith.mulf %31, %32 : vector<2x128xf32>
      %34 = arith.truncf %33 : vector<2x128xf32> to vector<2x128xbf16>
      %c0_20 = arith.constant 0 : index
      %c0_21 = arith.constant 0 : index
      %35 = vector.load %arg5[%c0_20, %c0_21] : memref<128x128xbf16, #tpu.memory_space<vmem>>, vector<128x128xbf16>
      %cst_22 = arith.constant dense<0.000000e+00> : vector<2x128xf32>
      %36 = tpu.matmul %34, %35, %cst_22 {dimension_numbers = #tpu.dot_dimension_numbers<[1], [0], [0], [1], [0, 0, 1, 1], [], []>} : vector<2x128xbf16>, vector<128x128xbf16>, vector<2x128xf32> -> vector<2x128xf32>
      %c0_23 = arith.constant 0 : index
      %c0_24 = arith.constant 0 : index
      %37 = vector.load %arg6[%c0_23, %c0_24] : memref<1x128xf32, #tpu.memory_space<vmem>>, vector<1x128xf32>
      %38 = vector.broadcast %37 : vector<1x128xf32> to vector<2x128xf32>
      %39 = arith.addf %36, %38 : vector<2x128xf32>
      %c0_25 = arith.constant 0 : index
      %c0_26 = arith.constant 0 : index
      %40 = vector.load %arg7[%c0_25, %c0_26] : memref<2x128xf32, #tpu.memory_space<vmem>>, vector<2x128xf32>
      tpu.vector_store %arg7[%c0_25, %c0_26], %39 {strides = array<i32>} : memref<2x128xf32, #tpu.memory_space<vmem>>, vector<2x128xf32>,
    } else {
    }
    return
  }
  func.func @transform_0(%arg0: i32, %arg1: i32) -> (i32, i32, i32) {
    %c0_i32 = arith.constant 0 : i32
    %c0_i32_0 = arith.constant 0 : i32
    return %arg0, %arg1, %c0_i32 : i32, i32, i32
  }
  func.func @transform_1(%arg0: i32, %arg1: i32) -> (i32, i32) {
    %c0_i32 = arith.constant 0 : i32
    %c0_i32_0 = arith.constant 0 : i32
    %c0_i32_1 = arith.constant 0 : i32
    return %c0_i32, %c0_i32_0 : i32, i32
  }
  func.func @transform_2(%arg0: i32, %arg1: i32) -> (i32, i32) {
    %c0_i32 = arith.constant 0 : i32
    %c0_i32_0 = arith.constant 0 : i32
    %c0_i32_1 = arith.constant 0 : i32
    return %c0_i32, %c0_i32_0 : i32, i32
  }
  func.func @transform_3(%arg0: i32, %arg1: i32) -> (i32, i32) {
    %c0_i32 = arith.constant 0 : i32
    %c0_i32_0 = arith.constant 0 : i32
    %c0_i32_1 = arith.constant 0 : i32
    return %c0_i32, %c0_i32_0 : i32, i32
  }
  func.func @transform_4(%arg0: i32, %arg1: i32) -> (i32, i32) {
    %c0_i32 = arith.constant 0 : i32
    %c0_i32_0 = arith.constant 0 : i32
    %c0_i32_1 = arith.constant 0 : i32
    return %c0_i32, %c0_i32_0 : i32, i32
  }
  func.func @transform_5(%arg0: i32, %arg1: i32) -> (i32, i32) {
    %c0_i32 = arith.constant 0 : i32
    %c0_i32_0 = arith.constant 0 : i32
    return %arg0, %c0_i32 : i32, i32
  }
}

</mosaic_0001>

<bundles_post_ra>
// kernel: model_wrapper_forward.1
= control target key start
LH: loop header
LB: loop body
LE: loop exit
PB: predicated region body
PF: predicated region fallthrough
CT: control target
= control target key end

     0   :  { %10 = vsyncpa [#allocation5], 0  ;;  %s837_s18 = smov 0   ;;  %s839_s19 = smov 0   ;;  %s968_s0 = inlined_call_operand.vmem [shape: bf16[2,16,48], index: 0, kind: input, shape index: {}]   ;;  %s969_s1 = inlined_call_operand.vmem [shape: bf16[48,128], index: 1, kind: input, shape index: {}]   ;;  %s970_s2 = inlined_call_operand.vmem [shape: f32[1,128], index: 2, kind: input, shape index: {}]   ;;  %s971_s3 = inlined_call_operand.vmem [shape: bf16[128,128], index: 3, kind: input, shape index: {}]   ;;  %s972_s4 = inlined_call_operand.vmem [shape: f32[1,128], index: 4, kind: input, shape index: {}]   ;;  %s973_s5 = inlined_call_operand.hbm [shape: f32[2,128], index: 5, kind: output, shape index: {}]  }
   0x1   :  { %s841_s20 = smov 0   ;;  %s843_s21 = smov 0  }
   0x2   :  { %s845_s22 = smov 0  }
   0x3 LB: > { %s592_s23 = sadd.s32 4294967295, %s799_s22   ;;  %s25_s24 = sadd.s32 1, %s795_s21  ;;  %s799_s22 = sphi %s845_s22, %s16_s22   ;;  %s795_s21 = sphi %s843_s21, %s978_s21   ;;  %s791_s20 = sphi %s841_s20, %s977_s20   ;;  %s787_s19 = sphi %s839_s19, %s976_s19   ;;  %s783_s18 = sphi %s837_s18, %s975_s18  }
   0x4   : > { %p26_p0 = scmp.ge.s32.totalorder %s25_s24, 2  ;;  %p44_p1 = scmp.ne.s32.totalorder %s787_s19, %s783_s18 }
   0x5   : > { %p45_p2 = scmp.eq.s32.totalorder %s799_s22, 0  ;;  %s37_s26 = sadd.s32 1, %s787_s19 }
   0x6   : > { %s980_s24 = smov (%p26_p0, %s25_s24), 0  ;;  %p594_p5 = scmp.ge.s32.totalorder %s799_s22, 2 }
   0x7   : > { %p46_p3 = por %p45_p2, %p44_p1  ;;  %s33_s25 = ssub.s32 %s795_s21, %s980_s24 }
   0x8   : > { %p35_p4 = scmp.eq.s32.totalorder %s33_s25, 0  ;;  %192 = sbr.rel (%p594_p5) target bundleno = 22 (0x16), region = 32 }
   0xa   : > { %s873_s27 = scalar_select %p35_p4, %s787_s19, %s37_s26  }
   0xf   : > { %195 = sbr.rel (!%p46_p3) target bundleno = 22 (0x16), region = 36  ;;  %s197_s28 = sand.u32 (%p46_p3), 1, %s787_s19  }
  0x10   : > { %s596_s29 = sshll.u32 (%p46_p3), %s795_s21, 2  ;;  %s595_s30 = sshll.u32 (%p46_p3), %s197_s28, 3 }
  0x11   : > { %s204_s8 = scalar_lea.vmem (%p46_p3), %s968_s0, %s596_s29  ;;  %s199_s9 = scalar_lea.vmem (%p46_p3), [#allocation3], %s595_s30 }
  0x12   : > { %v220_v0 = vld [vmem:[%s204_s8] sm:$0xf] (%p46_p3)  ;;  %v222_v1 = vld [vmem:[%s204_s8 + $0x8] sm:$0xf] (%p46_p3) }
  0x13   : > { %221 = vst [vmem:[%s199_s9] sm:$0xf] (%p46_p3), %v220_v0  ;;  %223 = vst [vmem:[%s199_s9 + $0x4] sm:$0xf] (%p46_p3), %v222_v1 }
  0x16 PF: > { %p597_p6 = scmp.ge.s32.totalorder %s799_s22, 1  ;;  %p249_p7 = scmp.lt.s32.totalorder %s799_s22, 3 }
  0x18   : > { %p250_p8 = pnand %p597_p6, %p249_p7 }
  0x19   : > { %s256_s10 = sand.u32 (!%p250_p8), 1, %s783_s18   ;;  %p599_p9 = scmp.ne.s32.totalorder (!%p250_p8), %s791_s20, 0 }
  0x1a   : > { %253 = sbr.rel (%p250_p8) target bundleno = 563 (0x233), region = 77  ;;  %s598_s11 = sshll.u32 (!%p250_p8), %s256_s10, 3 }
  0x1b   : > { %s258_s12 = scalar_lea.vmem (!%p250_p8), [#allocation3], %s598_s11 }
  0x21   : > { %283 = sbr.rel (%p599_p9) target bundleno = 40 (0x28), region = 85  ;;  %v801_v2 = vmov (!%p599_p9), 0.0  }
  0x22   : > { %284 = vst [vmem:[#allocation2] sm:$0x3] (!%p599_p9), %v801_v2 }
  0x28 PF: > { %v715_v3 = vld [vmem:[%s969_s1] sm:$0xff]   ;;  %v802_v4 = vmov 0.0   ;;  %v716_v5 = vld [vmem:[%s969_s1 + $0x8] sm:$0xff]   ;;  %vm803_vm0 = vmmov 0   ;;  %v717_v6 = vld [vmem:[%s969_s1 + $0x10] sm:$0xff]   ;;  %vm323_vm1 = vcmask 392192  }
  0x29   : > { %633 = vmatprep.subr.bf16.mxu0 %v802_v4  ;;  %639 = vmatprep.mubr.msk.bf16.mxu0 %vm803_vm0, %v802_v4  ;;  %v718_v7 = vld [vmem:[%s258_s12] sm:$0xff]   ;;  %v600_v8 = vld [vmem:[%s970_s2] ss:$0 sm:$0xff]  ;;  %vm401_vm2 = vcmask 1041409   ;;  %p606_p10 = scmp.ne.s32.totalorder %s791_s20, 1 }
  0x2a   : > { %634 = vmatpush3.bf16.msra.mxu0 %v715_v3  ;;  %v386_v44 = vld [vmem:[#allocation2] sm:$0x3]  ;;  %v804_v49 = vmov (!%p606_p10), 0.0   ;;  %v724_v50 = vld [vmem:[%s971_s3 + $0x8] sm:$0xff] (!%p606_p10)   ;;  %vm805_vm3 = vmmov (!%p606_p10), 0   ;;  %v725_v51 = vld [vmem:[%s971_s3 + $0x10] sm:$0xff] (!%p606_p10)  }
  0x2b   : > { %635 = vmatprep.subr.bf16.mxu0 %v802_v4  ;;  %v723_v48 = vld [vmem:[%s971_s3] sm:$0xff] (!%p606_p10)   ;;  %v726_v52 = vld [vmem:[%s971_s3 + $0x18] sm:$0xff] (!%p606_p10)   ;;  %v728_v54 = vld [vmem:[%s971_s3 + $0x28] sm:$0xff] (!%p606_p10)  }
  0x2c   : > { %v727_v53 = vld [vmem:[%s971_s3 + $0x20] sm:$0xff] (!%p606_p10)   ;;  %v729_v55 = vld [vmem:[%s971_s3 + $0x30] sm:$0xff] (!%p606_p10)   ;;  %v730_v58 = vld [vmem:[%s971_s3 + $0x38] sm:$0xff] (!%p606_p10)  }
  0x2d   : > { %v607_v60 = vld [vmem:[%s972_s4] ss:$0 sm:$0xff] (!%p606_p10) }
  0x2e   : > { %636 = vmatpush3.bf16.msra.mxu0 %v716_v5 }
  0x2f   : > { %637 = vmatprep.subr.bf16.mxu0 %v802_v4 }
  0x32   : > { %638 = vmatpush3.bf16.msra.mxu0 %v717_v6 }
  0x33   : > { %643 = vmatprep.subr.bf16.mxu0 (!%p606_p10), %v804_v49 }
  0x35   : > { %640 = vmatmul.mubr.msk.bf16.vlgmr.msra.gmra.mrb[0].mxu0 %vm323_vm1, %v718_v7 }
  0x36   : > { %644 = vmatpush3.bf16.msra.mxu0 (!%p606_p10), %v723_v48  ;;  %659 = vmatprep.mubr.msk.bf16.mxu0 (!%p606_p10), %vm805_vm3, %v804_v49 }
  0x37   : > { %645 = vmatprep.subr.bf16.mxu0 (!%p606_p10), %v804_v49 }
  0x3a   : > { %646 = vmatpush3.bf16.msra.mxu0 (!%p606_p10), %v724_v50 }
  0x3b   : > { %647 = vmatprep.subr.bf16.mxu0 (!%p606_p10), %v804_v49 }
  0x3e   : > { %648 = vmatpush3.bf16.msra.mxu0 (!%p606_p10), %v725_v51 }
  0x3f   : > { %649 = vmatprep.subr.bf16.mxu0 (!%p606_p10), %v804_v49 }
  0x42   : > { %650 = vmatpush3.bf16.msra.mxu0 (!%p606_p10), %v726_v52 }
  0x43   : > { %651 = vmatprep.subr.bf16.mxu0 (!%p606_p10), %v804_v49 }
  0x46   : > { %652 = vmatpush3.bf16.msra.mxu0 (!%p606_p10), %v727_v53 }
  0x47   : > { %653 = vmatprep.subr.bf16.mxu0 (!%p606_p10), %v804_v49 }
  0x4a   : > { %654 = vmatpush3.bf16.msra.mxu0 (!%p606_p10), %v728_v54 }
  0x4b   : > { %655 = vmatprep.subr.bf16.mxu0 (!%p606_p10), %v804_v49 }
  0x4e   : > { %656 = vmatpush3.bf16.msra.mxu0 (!%p606_p10), %v729_v55 }
  0x4f   : > { %657 = vmatprep.subr.bf16.mxu0 (!%p606_p10), %v804_v49 }
  0x52   : > { %658 = vmatpush3.bf16.msra.mxu0 (!%p606_p10), %v730_v58 }
 0x108   : > { %v361_v9 = vpop.f32.mrb[0].mxu0 }
 0x109   : > { %v362_v10 = vadd.f32 %v600_v8, %v361_v9  ;;  %v641_v11 = vpop.f32.mrb[1].mxu0 }
 0x10a   : > { %v364_v12 = vpop.f32.mrb[2].mxu0 }
 0x10b   : > { %v368_v13 = vmul.f32 %v362_v10, %v362_v10  ;;  %v365_v14 = vadd.f32 %v600_v8, %v364_v12  ;;  %v642_v15 = vpop.f32.mrb[3].mxu0 }
 0x10d   : > { %v370_v16 = vmul.f32 %v368_v13, %v362_v10  ;;  %v369_v17 = vmul.f32 %v365_v14, %v365_v14 }
 0x10f   : > { %v372_v18 = vmul.f32 0.044715, %v370_v16  ;;  %v371_v19 = vmul.f32 %v369_v17, %v365_v14 }
 0x111   : > { %v374_v20 = vadd.f32 %v372_v18, %v362_v10  ;;  %v373_v21 = vmul.f32 0.044715, %v371_v19 }
 0x113   : > { %v376_v22 = vmul.f32 0.7978846, %v374_v20  ;;  %v375_v23 = vadd.f32 %v373_v21, %v365_v14 }
 0x115   : > { %719 = vtanh.f32 %v376_v22  ;;  %v377_v24 = vmul.f32 0.7978846, %v375_v23 }
 0x117   : > { %721 = vtanh.f32 %v377_v24 }
 0x11f   : > { %v720_v25 = vpop.eup %719 }
 0x120   : > { %v380_v26 = vadd.f32 1.0, %v720_v25 }
 0x121   : > { %v722_v27 = vpop.eup %721 }
 0x122   : > { %v382_v28 = vmul.f32 0.5, %v380_v26  ;;  %v381_v29 = vadd.f32 1.0, %v722_v27 }
 0x124   : > { %v384_v30 = vmul.f32 %v382_v28, %v362_v10  ;;  %v383_v31 = vmul.f32 0.5, %v381_v29 }
 0x126   : > { %v387_v32 = vrot.slane %v384_v30, 4  ;;  %v385_v33 = vmul.f32 %v383_v31, %v365_v14 }
 0x128   : > { %v388_v34 = vadd.f32 %v387_v32, %v384_v30  ;;  %v393_v35 = vrot.slane %v385_v33, 4 }
 0x12a   : > { %v389_v36 = vrot.slane %v388_v34, 2  ;;  %v394_v37 = vadd.f32 %v393_v35, %v385_v33 }
 0x12c   : > { %v390_v38 = vadd.f32 %v389_v36, %v388_v34  ;;  %v395_v39 = vrot.slane %v394_v37, 2 }
 0x12e   : > { %v391_v40 = vrot.slane %v390_v38, 1  ;;  %v396_v41 = vadd.f32 %v395_v39, %v394_v37 }
 0x130   : > { %v397_v42 = vrot.slane %v396_v41, 1  ;;  %v392_v43 = vadd.f32 %v391_v40, %v390_v38 }
 0x131   : > { %409 = sbr.rel (%p606_p10) target bundleno = 538 (0x21a), region = 89 }
 0x132   : > { %v398_v45 = vadd.f32 %v397_v42, %v396_v41 }
 0x134   : > { %v402_v46 = vsel %vm401_vm2, %v398_v45, %v392_v43 }
 0x135   : > { %v404_v47 = vadd.f32 %v402_v46, %v386_v44 }
 0x137   : > { %405 = vst [vmem:[#allocation2] sm:$0x3] %v404_v47 }
 0x13e   : > { %v410_v56 = vld [vmem:[#allocation2] sm:$0x3] }
 0x13f   : > { %v411_v57 = vmul.f32 0.0625, %v410_v56 }
 0x141   : > { %v412_v59 = vpack.c.bf16 %v411_v57, %v411_v57 }
 0x143   : > { %660 = vmatmul.mubr.bf16.vlgmr.msra.gmra.mrb[0].mxu0 %v412_v59 }
 0x216   : > { %v518_v61 = vpop.f32.mrb[0].mxu0 }
 0x217   : > { %v519_v62 = vadd.f32 %v607_v60, %v518_v61  ;;  %v661_v63 = vpop.f32.mrb[1].mxu0 }
 0x218   : > { %v521_v0 = vpop.f32.mrb[2].mxu0 }
 0x219   : > { %524 = vst [vmem:[#allocation4] sm:$0x3] %v519_v62  ;;  %v662_v1 = vpop.f32.mrb[3].mxu0 }
 0x21a PF: > { %p927_p11 = scmp.eq.s32.totalorder %s592_s23, 1  ;;  %s806_s28 = smov [#allocation4]  }
 0x21b   : > { %s534_s29 = sshll.u32 %s806_s28, 4  ;;  %s535_s29 = int_to_ptr.vmem [resolvable:$true] %s534_s29 }
 0x21c   : > { %s731_s30 = scalar_lea.vmem %s535_s29, 32  ;;  %p738_p1 = scmp.lt.s32.totalorder %s535_s29, %s535_s29 }
 0x21d   : > { %p732_p12 = scmp.ne.s32.totalorder %s535_s29, %s731_s30  ;;  %p739_p2 = scmp.lt.s32.totalorder %s731_s30, %s731_s30 }
 0x21f   : > { %p733_p13 = pnand %p732_p12, %p927_p11  ;;  %p740_p3 = por %p739_p2, %p738_p1 }
 0x221   : > { %p734_p0 = pneg %p733_p13 }
 0x223   : > { %p741_p4 = pnand %p740_p3, %p734_p0 }
 0x225   : > { %744 = shalt.err (!%p741_p4)
}
 0x226   : > { %s745_s23 = scalar_lea.hbm %s973_s5, 32 }
 0x227   : > { %p746_p5 = scmp.ne.s32.totalorder %s973_s5, %s745_s23  ;;  %p751_p8 = scmp.lt.u32.totalorder %s745_s23, %s973_s5 }
 0x229   : > { %p747_p6 = pnand %p746_p5, %p927_p11 }
 0x22b   : > { %p748_p7 = pneg %p747_p6 }
 0x22d   : > { %p753_p9 = pnand %p751_p8, %p748_p7 }
 0x22f   : > { %756 = shalt.err (!%p753_p9)
}
 0x230   : > { %664 = dma.vmem_to_hbm [thread:$0]  (%p927_p11), %s535_s29, 32, %s973_s5, [#allocation5]  }
 0x231   : > { %778 = dma.done.wait (%p927_p11), [#allocation5], 32  }
 0x232   : > { %780 = vsyncadd (%p927_p11), [#allocation5], 4294967264 }
 0x233 PF: > { %s16_s22 = sadd.s32 1, %s799_s22   ;;  %s975_s18 = smov %s787_s19 }
 0x234   : > { %p13_p10 = scmp.ge.s32.totalorder %s16_s22, 4   ;;  %s976_s19 = smov %s873_s27 }
 0x235   : > { %s977_s20 = smov %s795_s21  ;;  %s978_s21 = smov %s980_s24 }
 0x236   :  { %15 = sbr.rel (!%p13_p10) target bundleno = 3 (0x3), region = 122 }
 0x23d   :  { %547 = vsyncpa [#allocation5], 1 }
 0x23e   :  { %549 = vsyncpa [#allocation5 + $0x1], 1 }

</bundles_post_ra>
